<compile_context>
chip_gen: v6e
topology: v6e:2x2x1
jax: 0.10.0
libtpu: 0.0.40
codegen_flags: <defaults>
</compile_context>

<pallas_src>
import jax
import jax.numpy as jnp
from jax import lax
from jax.experimental import pallas as pl
from jax.experimental.pallas import tpu as pltpu


def _round_up(x: int, m: int) -> int:
    return ((x + m - 1) // m) * m


def _make_mmd_kernel(batch: int, tb: int, ragged: bool):
    """batch, tb are Python ints; ragged == (batch % tb != 0)."""

    def mmd_kernel(f1_ref, f2_ref, out_ref, carry_ref):
        i = pl.program_id(1)  # batch-tile index (innermost, sequential axis)

        @pl.when(i == 0)
        def _():
            # New d-block (or first step): reset the resident output block and
            # the cross-tile carry.
            out_ref[...] = jnp.zeros_like(out_ref)
            carry_ref[...] = jnp.zeros_like(carry_ref)

        delta = f1_ref[...].astype(jnp.float32) - f2_ref[...].astype(jnp.float32)

        if ragged:
            # Last block sticks out past B: the out-of-range rows of the VMEM
            # buffer hold stale/garbage data, so zero them with a select (NaN /
            # Inf safe).  Only emitted when B is not a tile multiple.
            limit = batch - i * tb
            rows = lax.broadcasted_iota(jnp.int32, delta.shape, 0)
            delta = jnp.where(rows < limit, delta, 0.0)

        # prod[j] = delta[j] * delta[j-1]; row 0 wraps to delta[tb-1] (fixed
        # below with a row-level correction, no per-element mask).
        prod = delta * pltpu.roll(delta, shift=1, axis=0)
        colsum = jnp.sum(prod, axis=0, keepdims=True)            # (1, td)

        # Row 0's true predecessor is the carried last row of the previous
        # tile (zeros on the very first tile -> no predecessor term).
        corr = delta[0:1, :] * (carry_ref[...] - delta[tb - 1:tb, :])

        out_ref[0:1, :] = out_ref[0:1, :] + colsum + corr
        carry_ref[...] = delta[tb - 1:tb, :]

    return mmd_kernel


def _vmem_limit_bytes() -> int:
    phys = 64 * 1024 * 1024                 # conservative fallback (v7x physical)
    try:
        cap = getattr(pltpu.get_tpu_info(), "vmem_capacity_bytes", None)
        if cap:
            phys = int(cap)
    except Exception:
        pass
    # Half of physical (so v5e/v6e get 64 MiB, v7x gets 32 MiB), leaving room
    # for compiler-internal scratch and pipeline bookkeeping.
    return int(min(max(phys // 2, 16 * 1024 * 1024), 64 * 1024 * 1024))


def _pick_block_rows(batch: int, td: int, itemsize: int, vmem_limit: int) -> int:
    budget = (vmem_limit * 3) // 4
    # Per row of a tile:
    #   2 inputs * 2 pipeline buffers * itemsize        (double-buffered DMAs)
    # + ~4 f32 temporaries (delta / rolled copy / product / masked copy) that
    #   the body materializes: the roll breaks per-vreg fusion.
    per_row = td * (4 * itemsize + 4 * 4)
    tb = max(1, budget // per_row)
    # Bytes-based DMA-amortization cap: ~4 MiB per input block (per-step
    # pipeline overhead is amortized by bytes, not rows).
    tb = min(tb, max(1, (4 * 1024 * 1024) // (td * itemsize)))
    sub = max(8, 32 // itemsize)            # dtype-aware sublane packing
    tb = max(sub, (tb // sub) * sub)
    tb = min(tb, max(sub, (batch // sub) * sub))   # never (much) bigger than B
    return int(tb)


def mmd_loss(f1: jax.Array, f2: jax.Array, *, block_rows=None, d_splits=None) -> jax.Array:
    """Pallas TPU implementation of MMDLoss.forward.  f1, f2: (B, D)."""
    assert f1.shape == f2.shape and f1.ndim == 2
    B, D = f1.shape
    itemsize = jnp.dtype(f1.dtype).itemsize
    sub = max(8, 32 // itemsize)

    # Feature split: 2-way when cleanly possible so v7x's two TensorCores each
    # stream half of D (partial sums over D are additive).  Harmless on 1-TC
    # chips since per-block bytes (and total step count) are unchanged.
    if d_splits is None:
        d_splits = 2 if (D % 256 == 0 and D >= 256) else 1
    if D % d_splits != 0 or (d_splits > 1 and (D // d_splits) % 128 != 0):
        d_splits = 1
    td = D // d_splits

    vmem_limit = _vmem_limit_bytes()
    if block_rows is None:
        tb = _pick_block_rows(B, td, itemsize, vmem_limit)
    else:
        tb = max(sub, (int(block_rows) // sub) * sub)

    nb = (B + tb - 1) // tb
    ragged = (B % tb) != 0

    flops = 3 * B * D                                   # sub + mul + reduce-add
    bytes_accessed = 2 * B * D * itemsize + d_splits * 8 * td * 4

    out = pl.pallas_call(
        _make_mmd_kernel(B, tb, ragged),
        out_shape=jax.ShapeDtypeStruct((d_splits * 8, td), jnp.float32),
        grid_spec=pltpu.PrefetchScalarGridSpec(
            num_scalar_prefetch=0,
            grid=(d_splits, nb),                         # batch axis innermost
            in_specs=[
                pl.BlockSpec((tb, td), lambda d, i: (i, d)),
                pl.BlockSpec((tb, td), lambda d, i: (i, d)),
            ],
            # Output block is constant across the batch axis -> VMEM-resident
            # accumulator; written back to HBM once per d-block (8*td*4 bytes).
            out_specs=pl.BlockSpec((8, td), lambda d, i: (d, 0)),
            scratch_shapes=[
                pltpu.VMEM((1, td), jnp.float32),        # carried last delta row
            ],
        ),
        compiler_params=pltpu.CompilerParams(
            # Batch axis carries state (carry row + accumulator) -> must stay
            # sequential ("arbitrary"); only the D axis is parallel.
            dimension_semantics=("parallel", "arbitrary"),
            vmem_limit_bytes=vmem_limit,
        ),
        cost_estimate=pl.CostEstimate(
            flops=flops, transcendentals=0, bytes_accessed=bytes_accessed),
        # Optional sweep: pipeline_mode=pl.Buffered(3) on the input specs for
        # very small-D configs (sub-MiB blocks); marginal with the 4 MiB cap.
    )(f1, f2)

    # B == 1 -> 0 * inf = NaN, intentionally matching torch.mean over an empty
    # tensor.  Do not "fix".
    inv = jnp.float32(float("inf")) if B <= 1 else jnp.float32(1.0 / (B - 1))
    # Tiny (d_splits*8, td) partial-sum slab; the final reduce is a negligible
    # wrapper-side op.
    return jnp.sum(out) * inv


def mmd_loss_ref(f1, f2):
    delta = f1.astype(jnp.float32) - f2.astype(jnp.float32)
    return jnp.mean(jnp.sum(delta[:-1] * delta[1:], axis=1))


if __name__ == "__main__":
    key = jax.random.PRNGKey(0)
    k = jax.random.split(key, 8)

    # Case 1: single aligned tile (B=8, D=128 -> no D split, no ragged mask).
    f1 = jax.random.normal(k[0], (8, 128), dtype=jnp.float32)
    f2 = jax.random.normal(k[1], (8, 128), dtype=jnp.float32)
    out1 = mmd_loss(f1, f2)
    jax.block_until_ready(out1)
    ref1 = mmd_loss_ref(f1, f2)
    assert jnp.allclose(out1, ref1, rtol=1e-5, atol=1e-5), (out1, ref1)

    # Case 2: ragged batch + multiple tiles + cross-tile carry + 2-way D split
    # (B=20, tb=8 -> 3 tiles, last tile half-empty; D=256 -> td=128, n_d=2).
    g1 = jax.random.normal(k[2], (20, 256), dtype=jnp.float32)
    g2 = jax.random.normal(k[3], (20, 256), dtype=jnp.float32)
    out2 = mmd_loss(g1, g2, block_rows=8)
    jax.block_until_ready(out2)
    ref2 = mmd_loss_ref(g1, g2)
    assert jnp.allclose(out2, ref2, rtol=1e-5, atol=1e-5), (out2, ref2)

    # Case 3: auto block sizing, ragged last tile, D not 256-splittable.
    h1 = jax.random.normal(k[4], (300, 384), dtype=jnp.float32)
    h2 = jax.random.normal(k[5], (300, 384), dtype=jnp.float32)
    out3 = mmd_loss(h1, h2)
    jax.block_until_ready(out3)
    ref3 = mmd_loss_ref(h1, h2)
    assert jnp.allclose(out3, ref3, rtol=1e-4, atol=1e-4), (out3, ref3)

    # Case 4: bf16 inputs exercise the dtype-aware sublane rounding (sub=16).
    b1 = jax.random.normal(k[6], (50, 256), dtype=jnp.bfloat16)
    b2 = jax.random.normal(k[7], (50, 256), dtype=jnp.bfloat16)
    out4 = mmd_loss(b1, b2)
    jax.block_until_ready(out4)
    ref4 = mmd_loss_ref(b1, b2)
    assert jnp.allclose(out4, ref4, rtol=1e-3, atol=1e-3), (out4, ref4)

    print("KERNEL_OK")
</pallas_src>

<mosaic_0001>
module attributes {stable_mosaic.version = 11 : i64} {
  func.func @mmd_kernel(%arg0: i32, %arg1: i32, %arg2: memref<8x128xf32, #tpu.memory_space<vmem>>, %arg3: memref<8x128xf32, #tpu.memory_space<vmem>>, %arg4: memref<8x128xf32, #tpu.memory_space<vmem>>, %arg5: memref<1x128xf32, #tpu.memory_space<vmem>>) attributes {dimension_semantics = [#tpu.dimension_semantics<parallel>, #tpu.dimension_semantics<arbitrary>], iteration_bounds = array<i64: 1, 1>, scalar_prefetch = 0 : i64, scratch_operands = 1 : i64, tpu.core_type = #tpu.core_type<tc>, window_params = [{transform_indices = @transform_0, window_bounds = array<i64: 8, 128>}, {transform_indices = @transform_1, window_bounds = array<i64: 8, 128>}, {transform_indices = @transform_2, window_bounds = array<i64: 8, 128>}]} {
    %c0_i32 = arith.constant 0 : i32
    %0 = arith.cmpi eq, %arg1, %c0_i32 : i32
    %1 = arith.extui %0 : i1 to i32
    %c0_i32_0 = arith.constant 0 : i32
    %2 = arith.cmpi ne, %1, %c0_i32_0 : i32
    scf.if %2 {
      %cst_12 = arith.constant 0.000000e+00 : f32
      %21 = vector.broadcast %cst_12 : f32 to vector<8x128xf32>
      %c0_13 = arith.constant 0 : index
      %c0_14 = arith.constant 0 : index
      %22 = vector.load %arg4[%c0_13, %c0_14] : memref<8x128xf32, #tpu.memory_space<vmem>>, vector<8x128xf32>
      tpu.vector_store %arg4[%c0_13, %c0_14], %21 {strides = array<i32>} : memref<8x128xf32, #tpu.memory_space<vmem>>, vector<8x128xf32>,
      %cst_15 = arith.constant 0.000000e+00 : f32
      %23 = vector.broadcast %cst_15 : f32 to vector<1x128xf32>
      %c0_16 = arith.constant 0 : index
      %c0_17 = arith.constant 0 : index
      %24 = vector.load %arg5[%c0_16, %c0_17] : memref<1x128xf32, #tpu.memory_space<vmem>>, vector<1x128xf32>
      tpu.vector_store %arg5[%c0_16, %c0_17], %23 {strides = array<i32>} : memref<1x128xf32, #tpu.memory_space<vmem>>, vector<1x128xf32>,
    } else {
    }
    %c0 = arith.constant 0 : index
    %c0_1 = arith.constant 0 : index
    %3 = vector.load %arg2[%c0, %c0_1] : memref<8x128xf32, #tpu.memory_space<vmem>>, vector<8x128xf32>
    %c0_2 = arith.constant 0 : index
    %c0_3 = arith.constant 0 : index
    %4 = vector.load %arg3[%c0_2, %c0_3] : memref<8x128xf32, #tpu.memory_space<vmem>>, vector<8x128xf32>
    %5 = arith.subf %3, %4 : vector<8x128xf32>
    %c1_i32 = arith.constant 1 : i32
    %6 = tpu.dynamic_rotate %5 by %c1_i32 dim 0 : vector<8x128xf32>, i32 -> vector<8x128xf32>
    %7 = arith.mulf %5, %6 : vector<8x128xf32>
    %cst = arith.constant dense<0.000000e+00> : vector<128xf32>
    %8 = vector.multi_reduction <add>, %7, %cst [0] : vector<8x128xf32> to vector<128xf32>
    %9 = vector.shape_cast %8 : vector<128xf32> to vector<1x128xf32>
    %10 = vector.extract_strided_slice %5 {offsets = [0, 0], sizes = [1, 128], strides = [1, 1]} : vector<8x128xf32> to vector<1x128xf32>
    %c0_4 = arith.constant 0 : index
    %c0_5 = arith.constant 0 : index
    %11 = vector.load %arg5[%c0_4, %c0_5] : memref<1x128xf32, #tpu.memory_space<vmem>>, vector<1x128xf32>
    %12 = vector.extract_strided_slice %5 {offsets = [7, 0], sizes = [1, 128], strides = [1, 1]} : vector<8x128xf32> to vector<1x128xf32>
    %13 = arith.subf %11, %12 : vector<1x128xf32>
    %14 = arith.mulf %10, %13 : vector<1x128xf32>
    %c0_6 = arith.constant 0 : index
    %c0_7 = arith.constant 0 : index
    %15 = vector.load %arg4[%c0_6, %c0_7] : memref<8x128xf32, #tpu.memory_space<vmem>>, vector<1x128xf32>
    %16 = arith.addf %15, %9 : vector<1x128xf32>
    %17 = arith.addf %16, %14 : vector<1x128xf32>
    %c0_8 = arith.constant 0 : index
    %c0_9 = arith.constant 0 : index
    %18 = vector.load %arg4[%c0_8, %c0_9] : memref<8x128xf32, #tpu.memory_space<vmem>>, vector<1x128xf32>
    tpu.vector_store %arg4[%c0_8, %c0_9], %17 {strides = array<i32>} : memref<8x128xf32, #tpu.memory_space<vmem>>, vector<1x128xf32>,
    %19 = vector.extract_strided_slice %5 {offsets = [7, 0], sizes = [1, 128], strides = [1, 1]} : vector<8x128xf32> to vector<1x128xf32>
    %c0_10 = arith.constant 0 : index
    %c0_11 = arith.constant 0 : index
    %20 = vector.load %arg5[%c0_10, %c0_11] : memref<1x128xf32, #tpu.memory_space<vmem>>, vector<1x128xf32>
    tpu.vector_store %arg5[%c0_10, %c0_11], %19 {strides = array<i32>} : memref<1x128xf32, #tpu.memory_space<vmem>>, vector<1x128xf32>,
    return
  }
  func.func @transform_0(%arg0: i32, %arg1: i32) -> (i32, i32) {
    %c0_i32 = arith.constant 0 : i32
    return %arg1, %arg0 : i32, i32
  }
  func.func @transform_1(%arg0: i32, %arg1: i32) -> (i32, i32) {
    %c0_i32 = arith.constant 0 : i32
    return %arg1, %arg0 : i32, i32
  }
  func.func @transform_2(%arg0: i32, %arg1: i32) -> (i32, i32) {
    %c0_i32 = arith.constant 0 : i32
    %c0_i32_0 = arith.constant 0 : i32
    return %arg0, %c0_i32 : i32, i32
  }
}

</mosaic_0001>

<bundles_post_ra>
// kernel: tpu_custom_call.1
= control target key start
LH: loop header
LB: loop body
LE: loop exit
PB: predicated region body
PF: predicated region fallthrough
CT: control target
= control target key end

     0   :  { %7 = vsyncpa [#allocation4], 0  ;;  %s196_s0 = inlined_call_operand.hbm [shape: f32[8,128], index: 0, kind: input, shape index: {}]   ;;  %s197_s1 = inlined_call_operand.hbm [shape: f32[8,128], index: 1, kind: input, shape index: {}]   ;;  %s198_s2 = inlined_call_operand.hbm [shape: f32[8,128], index: 2, kind: output, shape index: {}]  }
   0x1   :  { %8 = vsyncpa [#allocation7], 0 }
   0x2   :  { %9 = vsyncpa [#allocation5], 0  ;;  %s167_s9 = smov [#allocation3]   ;;  %s168_s11 = smov [#allocation6]  }
   0x3   :  { %s16_s10 = sshll.u32 %s167_s9, 4  ;;  %s26_s12 = sshll.u32 %s168_s11, 4  ;;  %s17_s10 = int_to_ptr.vmem [resolvable:$true] %s16_s10  ;;  %s27_s12 = int_to_ptr.vmem [resolvable:$true] %s26_s12 }
   0x4   :  { %s109_s13 = scalar_lea.vmem %s17_s10, 128  ;;  %p114_p1 = scmp.lt.s32.totalorder %s17_s10, %s17_s10 }
   0x5   :  { %p110_p0 = scmp.ne.s32.totalorder %s17_s10, %s109_s13  ;;  %p115_p2 = scmp.lt.s32.totalorder %s109_s13, %s109_s13 }
   0x7   :  { %p116_p3 = por %p115_p2, %p114_p1 }
   0x9   :  { %p117_p4 = pnand %p116_p3, %p110_p0 }
   0xb   :  { %120 = shalt.err (!%p117_p4)
}
   0xc   :  { %19 = dma.hbm_to_vmem [thread:$0]  %s196_s0, 128, %s17_s10, [#allocation4]  }
   0xd   :  { %s129_s16 = scalar_lea.vmem %s27_s12, 128  ;;  %p134_p6 = scmp.lt.s32.totalorder %s27_s12, %s27_s12 }
   0xe   :  { %p130_p5 = scmp.ne.s32.totalorder %s27_s12, %s129_s16  ;;  %p135_p7 = scmp.lt.s32.totalorder %s129_s16, %s129_s16 }
  0x10   :  { %p136_p8 = por %p135_p7, %p134_p6 }
  0x12   :  { %p137_p9 = pnand %p136_p8, %p130_p5 }
  0x14   :  { %140 = shalt.err (!%p137_p9)
}
  0x15   :  { %29 = dma.hbm_to_vmem [thread:$0]  %s197_s1, 128, %s27_s12, [#allocation7]  }
  0x16   :  { %161 = dma.done.wait [#allocation4], 128  }
  0x17   :  { %162 = vsyncadd [#allocation4], 4294967168 }
  0x18   :  { %163 = dma.done.wait [#allocation7], 128  }
  0x19   :  { %164 = vsyncadd [#allocation7], 4294967168  ;;  %v59_v0 = vlaneseq  ;;  %v169_v1 = vmov 0.0   ;;  %v170_v2 = vmov 1966171168   ;;  %v42_v6 = vld [vmem:[#allocation3] sm:$0xff] }
  0x1a   :  { %41 = vst [vmem:[#allocation2] sm:$0x1] %v169_v1  ;;  %40 = vst [vmem:[#allocation8] sm:$0xff] %v169_v1  ;;  %v57_v3 = vunpack.c.l.s4 %v170_v2  ;;  %v43_v7 = vld [vmem:[#allocation6] sm:$0xff]  ;;  %s171_s0 = smov [#allocation8]  }
  0x1b   :  { %v60_v5 = vshrl.u32 %v59_v0, 7  ;;  %v44_v8 = vsub.f32 %v42_v6, %v43_v7  ;;  %s86_s1 = sshll.u32 %s171_s0, 4  ;;  %s87_s1 = int_to_ptr.vmem [resolvable:$true] %s86_s1 }
  0x1c   :  { %v58_v4 = vunpack.c.0.s8 %v57_v3  ;;  %s141_s19 = scalar_lea.vmem %s87_s1, 128  ;;  %p146_p11 = scmp.lt.s32.totalorder %s87_s1, %s87_s1 }
  0x1d   :  { %v45_v11 = vrot.slane %v44_v8, 7  ;;  %v55_v12 = vcombine.high %v44_v8, %v44_v8  ;;  %p142_p10 = scmp.ne.s32.totalorder %s87_s1, %s141_s19  ;;  %p147_p12 = scmp.lt.s32.totalorder %s141_s19, %s141_s19 }
  0x1e   :  { %v61_v9 = vsub.s32 %v58_v4, %v60_v5 }
  0x1f   :  { %v46_v13 = vmul.f32 %v45_v11, %v44_v8  ;;  %p148_p13 = por %p147_p12, %p146_p11 }
  0x20   :  { %v62_v14 = vrot.slane %v55_v12, %v61_v9 }
  0x21   :  { %v53_v10 = vld [vmem:[#allocation2] sm:$0x1]  ;;  %v47_v15 = vrot.slane %v46_v13, 4  ;;  %v75_v24 = vld [vmem:[#allocation8] sm:$0x1]  ;;  %p149_p0 = pnand %p148_p13, %p142_p10 }
  0x22   :  { %79 = vst [vmem:[#allocation2 - $0x7] sm:$0x80] %v44_v8  ;;  %v63_v16 = vcombine.high %v62_v14, %v62_v14 }
  0x23   :  { %v48_v17 = vadd.f32 %v47_v15, %v46_v13 }
  0x24   :  { %v70_v18 = vrot.slane %v63_v16, %v61_v9 }
  0x25   :  { %v49_v19 = vrot.slane %v48_v17, 2 }
  0x26   :  { %v71_v20 = vcombine.high %v70_v18, %v70_v18 }
  0x27   :  { %v50_v21 = vadd.f32 %v49_v19, %v48_v17 }
  0x28   :  { %v73_v22 = vsub.f32 %v53_v10, %v71_v20 }
  0x29   :  { %v51_v23 = vrot.slane %v50_v21, 1 }
  0x2a   :  { %v74_v26 = vmul.f32 %v73_v22, %v44_v8 }
  0x2b   :  { %v52_v25 = vadd.f32 %v51_v23, %v50_v21 }
  0x2d   :  { %v76_v27 = vadd.f32 %v75_v24, %v52_v25 }
  0x2f   :  { %v77_v28 = vadd.f32 %v76_v27, %v74_v26 }
  0x31   :  { %78 = vst [vmem:[#allocation8] sm:$0x1] %v77_v28 }
  0x32   :  { %152 = shalt.err (!%p149_p0)
}
  0x33   :  { %89 = dma.vmem_to_hbm [thread:$0]  %s87_s1, 128, %s198_s2, [#allocation5]  }
  0x34   :  { %165 = dma.done.wait [#allocation5], 128  }
  0x35   :  { %166 = vsyncadd [#allocation5], 4294967168 }
  0x36   :  { %93 = vsyncpa [#allocation4], 1 }
  0x37   :  { %94 = vsyncpa [#allocation7], 1 }
  0x38   :  { %95 = vsyncpa [#allocation5], 1 }

</bundles_post_ra>
